<compile_context>
chip_gen: v7x
topology: tpu7x:2x2x1
jax: 0.10.0
libtpu: 0.0.40
codegen_flags: <defaults>
</compile_context>

<pallas_src>
import functools
import math

import jax
import jax.numpy as jnp
from jax.scipy import linalg as jsp_linalg
from jax.experimental import pallas as pl
from jax.experimental.pallas import tpu as pltpu


def _softmin_vq_kernel(temp_ref, x_ref, wc_ref, wo_ref, ws_ref, wr_ref, psq_ref,
                       quant_ref, dists_ref, loss_ref, *, n_groups, n_protos):
    G, P = n_groups, n_protos
    temp = temp_ref[0, 0]                      # softmin temperature (SMEM scalar)
    x = x_ref[...]                             # (Bt, G*D) f32, lane-dense

    # All-group cross terms and ||x_k||^2 broadcast on the (mostly idle) MXU.
    cross2 = jnp.dot(x, wc_ref[...], preferred_element_type=jnp.float32)    # (Bt, G*P): -2 x.p
    sqb = jnp.dot(x * x, wo_ref[...], preferred_element_type=jnp.float32)   # (Bt, G*P): ||x_k||^2

    base = cross2 + psq_ref[...]               # ||p||^2 - 2 x.p            (one slab op)
    dists_ref[...] = sqb + base                # squared distances           (one full store)

    # softmin == softmax(-temp * dists); the per-(row,group) constant ||x_k||^2 is dropped
    # (exact: it cancels under the per-group max subtraction + normalization below).
    logits = -temp * base                                                    # (Bt, G*P)

    # Per-group max replicated across each group's P lanes (mask-select assembly, no concat).
    lane = jax.lax.broadcasted_iota(jnp.int32, logits.shape, 1)
    m_full = jnp.zeros_like(logits)
    for k in range(G):                         # G is a small static constant -> unrolled
        m_k = jnp.max(logits[:, k * P:(k + 1) * P], axis=-1, keepdims=True)  # (Bt, 1)
        m_full = jnp.where((lane >= k * P) & (lane < (k + 1) * P), m_k, m_full)

    e = jnp.exp(logits - m_full)                                             # one slab exp (EUP)
    # Per-group exp-sums, replicated across each group's lanes, via a block-diag ones matmul.
    s_full = jnp.dot(e, ws_ref[...], preferred_element_type=jnp.float32)     # (Bt, G*P)
    # Pre-normalize (P < D -> fewer multiplies than post-matmul normalization); exact
    # reciprocal keeps the 1e-4 forward tolerance (approx=True would offload to the EUP).
    att = e * pl.reciprocal(s_full)                                          # softmax weights
    q = jnp.dot(att, wr_ref[...], preferred_element_type=jnp.float32)        # (Bt, G*D)
    quant_ref[...] = q                                                       # one full store

    # Per-tile SSE partial (commitment == embedding numerically in the forward pass).
    diff = q - x
    loss_ref[...] = jnp.broadcast_to(jnp.sum(diff * diff), loss_ref.shape)   # (8,128) splat


def build_vq_constants(proto_vecs, softmin_temp=1.0):
    """Build the VMEM-resident block-diagonal prototype matrices ONCE (hoisted per review)."""
    G, P, D = proto_vecs.shape
    p32 = proto_vecs.astype(jnp.float32)
    w_cross = jsp_linalg.block_diag(*[-2.0 * p32[k].T for k in range(G)])      # (G*D, G*P)
    w_ones = jsp_linalg.block_diag(*([jnp.ones((D, P), jnp.float32)] * G))     # (G*D, G*P)
    w_sum = jsp_linalg.block_diag(*([jnp.ones((P, P), jnp.float32)] * G))      # (G*P, G*P)
    w_rec = jsp_linalg.block_diag(*[p32[k] for k in range(G)])                 # (G*P, G*D)
    psq = jnp.sum(p32 * p32, axis=-1).reshape(1, G * P)                        # (1, G*P)
    temp = jnp.full((1, 1), softmin_temp, dtype=jnp.float32)
    return w_cross, w_ones, w_sum, w_rec, psq, temp


def _pick_batch_tile(batch, block_b):
    cands = [d for d in range(1, min(block_b, batch) + 1)
             if batch % d == 0 and (d % 8 == 0 or d == batch)]
    return max(cands) if cands else batch


def softmin_vq_forward(latents, constants, *, beta=0.25, block_b=1024):
    """latents: (B, G, D) f32 -> (quantized (B,G,D), vq_loss scalar, dists dict k->(B,P))."""
    B, G, D = latents.shape
    w_cross, w_ones, w_sum, w_rec, psq, temp = constants
    GD, GP = w_cross.shape
    assert GD == G * D and GP % G == 0
    P = GP // G
    f32 = jnp.float32

    bt = _pick_batch_tile(B, block_b)
    num_tiles = B // bt
    x_flat = latents.reshape(B, GD).astype(f32)

    # Generation-aware VMEM budget: resident block-diag weights + double-buffered tiles.
    resident = 4 * (2 * GD * GP + GP * GP + GP * GD + GP + 2)
    per_tile = 4 * (2 * bt * GD + bt * GP + 8 * 128)
    vmem_need = resident + 2 * per_tile
    assert vmem_need <= 48 * 2 ** 20, "VMEM budget exceeded: shrink block_b (v7x-safe cap)"
    vmem_limit = int(min(max(2 * vmem_need, 16 * 2 ** 20), 48 * 2 ** 20))

    kernel = functools.partial(_softmin_vq_kernel, n_groups=G, n_protos=P)

    quant_flat, dists_flat, loss_part = pl.pallas_call(
        kernel,
        grid=(num_tiles,),
        in_specs=[
            pl.BlockSpec(memory_space=pltpu.MemorySpace.SMEM),   # softmin temperature (scalar)
            pl.BlockSpec((bt, GD), lambda i: (i, 0)),            # latents tile (pipelined DMA)
            pl.BlockSpec((GD, GP), lambda i: (0, 0)),            # blkdiag(-2 p^T): VMEM-resident
            pl.BlockSpec((GD, GP), lambda i: (0, 0)),            # blkdiag(ones(D,P))
            pl.BlockSpec((GP, GP), lambda i: (0, 0)),            # blkdiag(ones(P,P))
            pl.BlockSpec((GP, GD), lambda i: (0, 0)),            # blkdiag(p)
            pl.BlockSpec((1, GP), lambda i: (0, 0)),             # ||proto||^2
        ],
        out_specs=(
            pl.BlockSpec((bt, GD), lambda i: (i, 0)),            # quantized latents (flat)
            pl.BlockSpec((bt, GP), lambda i: (i, 0)),            # squared distances (flat)
            pl.BlockSpec((8, 128), lambda i: (i, 0)),            # per-tile SSE partial block
        ),
        out_shape=(
            jax.ShapeDtypeStruct((B, GD), f32),
            jax.ShapeDtypeStruct((B, GP), f32),
            jax.ShapeDtypeStruct((num_tiles * 8, 128), f32),
        ),
        compiler_params=pltpu.CompilerParams(
            dimension_semantics=("parallel",),   # no revisited blocks -> megacore-shardable
            vmem_limit_bytes=vmem_limit,
        ),
    )(temp, x_flat, w_cross, w_ones, w_sum, w_rec, psq)

    quantized = quant_flat.reshape(B, G, D)
    dists = dists_flat.reshape(B, G, P)
    # Each tile's partial SSE is replicated across its (8,128) block; take one lane per tile.
    sse = jnp.sum(loss_part.reshape(num_tiles, 8, 128)[:, 0, 0])
    mse_sum = sse / (B * D)                    # sum_k mse(q_k, x_k)
    vq_loss = (beta * mse_sum + mse_sum) / G   # commitment == embedding in the forward pass
    return quantized, vq_loss, {k: dists[:, k, :] for k in range(G)}


if __name__ == "__main__":
    B, G, P, D = 16, 2, 8, 32          # batch, proto groups, protos per group, latent dim/group
    beta, softmin_temp = 0.25, 1.0

    key = jax.random.PRNGKey(0)
    kx, kp = jax.random.split(key)
    latents = jax.random.normal(kx, (B, G, D), dtype=jnp.float32)
    # torch.nn.init.xavier_uniform_ on a (P, D) parameter: bound = sqrt(6 / (P + D))
    bound = math.sqrt(6.0 / (P + D))
    proto_vecs = jax.random.uniform(kp, (G, P, D), jnp.float32, minval=-bound, maxval=bound)

    constants = build_vq_constants(proto_vecs, softmin_temp)   # built ONCE (hoisted)
    quantized, vq_loss, dists = softmin_vq_forward(latents, constants, beta=beta, block_b=8)
    quantized = jax.block_until_ready(quantized)
    vq_loss = jax.block_until_ready(vq_loss)

    # ---- pure-JAX reference mirroring the PyTorch forward ----
    d_ref = jnp.sum((latents[:, :, None, :] - proto_vecs[None, :, :, :]) ** 2, axis=-1)  # (B,G,P)
    att = jax.nn.softmax(-softmin_temp * d_ref, axis=-1)
    q_ref = jnp.sum(att[..., None] * proto_vecs[None, :, :, :], axis=2)                  # (B,G,D)
    mse_sum_ref = jnp.sum(jnp.mean((q_ref - latents) ** 2, axis=(0, 2)))
    vq_ref = (beta * mse_sum_ref + mse_sum_ref) / G

    dists_arr = jnp.stack([dists[k] for k in range(G)], axis=1)
    assert quantized.shape == latents.shape
    assert jnp.allclose(quantized, q_ref, atol=1e-4, rtol=1e-4), "quantized mismatch"
    assert jnp.allclose(dists_arr, d_ref, atol=1e-4, rtol=1e-4), "dists mismatch"
    assert jnp.allclose(vq_loss, vq_ref, atol=1e-4, rtol=1e-4), "vq_loss mismatch"

    print("KERNEL_OK")
</pallas_src>

<mosaic_0001>
module attributes {stable_mosaic.version = 11 : i64} {
  func.func @_softmin_vq_kernel(%arg0: i32, %arg1: memref<1x1xf32, #tpu.memory_space<smem>>, %arg2: memref<8x64xf32, #tpu.memory_space<vmem>>, %arg3: memref<64x16xf32, #tpu.memory_space<vmem>>, %arg4: memref<64x16xf32, #tpu.memory_space<vmem>>, %arg5: memref<16x16xf32, #tpu.memory_space<vmem>>, %arg6: memref<16x64xf32, #tpu.memory_space<vmem>>, %arg7: memref<1x16xf32, #tpu.memory_space<vmem>>, %arg8: memref<8x64xf32, #tpu.memory_space<vmem>>, %arg9: memref<8x16xf32, #tpu.memory_space<vmem>>, %arg10: memref<8x128xf32, #tpu.memory_space<vmem>>) attributes {dimension_semantics = [#tpu.dimension_semantics<parallel>], iteration_bounds = array<i64: 2>, scalar_prefetch = 0 : i64, scratch_operands = 0 : i64, tpu.core_type = #tpu.core_type<tc>, window_params = [{transform_indices = @transform_0, window_bounds = array<i64: 1, 1>}, {transform_indices = @transform_1, window_bounds = array<i64: 8, 64>}, {pipeline_mode = #tpu.pipeline_mode<synchronous>, transform_indices = @transform_2, window_bounds = array<i64: 64, 16>}, {pipeline_mode = #tpu.pipeline_mode<synchronous>, transform_indices = @transform_3, window_bounds = array<i64: 64, 16>}, {pipeline_mode = #tpu.pipeline_mode<synchronous>, transform_indices = @transform_4, window_bounds = array<i64: 16, 16>}, {pipeline_mode = #tpu.pipeline_mode<synchronous>, transform_indices = @transform_5, window_bounds = array<i64: 16, 64>}, {pipeline_mode = #tpu.pipeline_mode<synchronous>, transform_indices = @transform_6, window_bounds = array<i64: 1, 16>}, {transform_indices = @transform_7, window_bounds = array<i64: 8, 64>}, {transform_indices = @transform_8, window_bounds = array<i64: 8, 16>}, {transform_indices = @transform_9, window_bounds = array<i64: 8, 128>}]} {
    %c0 = arith.constant 0 : index
    %c0_0 = arith.constant 0 : index
    %0 = memref.load %arg1[%c0, %c0_0] : memref<1x1xf32, #tpu.memory_space<smem>>
    %c0_1 = arith.constant 0 : index
    %c0_2 = arith.constant 0 : index
    %1 = vector.load %arg2[%c0_1, %c0_2] : memref<8x64xf32, #tpu.memory_space<vmem>>, vector<8x64xf32>
    %c0_3 = arith.constant 0 : index
    %c0_4 = arith.constant 0 : index
    %2 = vector.load %arg3[%c0_3, %c0_4] : memref<64x16xf32, #tpu.memory_space<vmem>>, vector<64x16xf32>
    %cst = arith.constant dense<0.000000e+00> : vector<8x16xf32>
    %3 = tpu.matmul %1, %2, %cst {dimension_numbers = #tpu.dot_dimension_numbers<[1], [0], [0], [1], [0, 0, 1, 1], [], []>} : vector<8x64xf32>, vector<64x16xf32>, vector<8x16xf32> -> vector<8x16xf32>
    %4 = arith.mulf %1, %1 : vector<8x64xf32>
    %c0_5 = arith.constant 0 : index
    %c0_6 = arith.constant 0 : index
    %5 = vector.load %arg4[%c0_5, %c0_6] : memref<64x16xf32, #tpu.memory_space<vmem>>, vector<64x16xf32>
    %cst_7 = arith.constant dense<0.000000e+00> : vector<8x16xf32>
    %6 = tpu.matmul %4, %5, %cst_7 {dimension_numbers = #tpu.dot_dimension_numbers<[1], [0], [0], [1], [0, 0, 1, 1], [], []>} : vector<8x64xf32>, vector<64x16xf32>, vector<8x16xf32> -> vector<8x16xf32>
    %c0_8 = arith.constant 0 : index
    %c0_9 = arith.constant 0 : index
    %7 = vector.load %arg7[%c0_8, %c0_9] : memref<1x16xf32, #tpu.memory_space<vmem>>, vector<1x16xf32>
    %8 = vector.broadcast %7 : vector<1x16xf32> to vector<8x16xf32>
    %9 = arith.addf %3, %8 : vector<8x16xf32>
    %10 = arith.addf %6, %9 : vector<8x16xf32>
    %c0_10 = arith.constant 0 : index
    %c0_11 = arith.constant 0 : index
    %11 = vector.load %arg9[%c0_10, %c0_11] : memref<8x16xf32, #tpu.memory_space<vmem>>, vector<8x16xf32>
    tpu.vector_store %arg9[%c0_10, %c0_11], %10 {strides = array<i32>} : memref<8x16xf32, #tpu.memory_space<vmem>>, vector<8x16xf32>,
    %cst_12 = arith.constant 0.000000e+00 : f32
    %12 = arith.subf %cst_12, %0 : f32
    %13 = vector.broadcast %12 : f32 to vector<8x16xf32>
    %14 = arith.mulf %13, %9 : vector<8x16xf32>
    %15 = tpu.iota {dimensions = array<i32: 1>} : vector<8x16xi32>
    %cst_13 = arith.constant 0.000000e+00 : f32
    %16 = vector.broadcast %cst_13 : f32 to vector<8x16xf32>
    %17 = vector.extract_strided_slice %14 {offsets = [0, 0], sizes = [8, 8], strides = [1, 1]} : vector<8x16xf32> to vector<8x8xf32>
    %cst_14 = arith.constant dense<0xFF800000> : vector<8xf32>
    %18 = vector.multi_reduction <maximumf>, %17, %cst_14 [1] : vector<8x8xf32> to vector<8xf32>
    %19 = vector.shape_cast %18 : vector<8xf32> to vector<8x1xf32>
    %c0_i32 = arith.constant 0 : i32
    %20 = vector.broadcast %c0_i32 : i32 to vector<8x16xi32>
    %21 = arith.cmpi sge, %15, %20 : vector<8x16xi32>
    %c8_i32 = arith.constant 8 : i32
    %22 = vector.broadcast %c8_i32 : i32 to vector<8x16xi32>
    %23 = arith.cmpi slt, %15, %22 : vector<8x16xi32>
    %24 = arith.andi %21, %23 : vector<8x16xi1>
    %25 = vector.shape_cast %19 : vector<8x1xf32> to vector<8x1xf32>
    %26 = vector.broadcast %25 : vector<8x1xf32> to vector<8x16xf32>
    %27 = arith.select %24, %26, %16 : vector<8x16xi1>, vector<8x16xf32>
    %28 = vector.extract_strided_slice %14 {offsets = [0, 8], sizes = [8, 8], strides = [1, 1]} : vector<8x16xf32> to vector<8x8xf32>
    %cst_15 = arith.constant dense<0xFF800000> : vector<8xf32>
    %29 = vector.multi_reduction <maximumf>, %28, %cst_15 [1] : vector<8x8xf32> to vector<8xf32>
    %30 = vector.shape_cast %29 : vector<8xf32> to vector<8x1xf32>
    %c8_i32_16 = arith.constant 8 : i32
    %31 = vector.broadcast %c8_i32_16 : i32 to vector<8x16xi32>
    %32 = arith.cmpi sge, %15, %31 : vector<8x16xi32>
    %c16_i32 = arith.constant 16 : i32
    %33 = vector.broadcast %c16_i32 : i32 to vector<8x16xi32>
    %34 = arith.cmpi slt, %15, %33 : vector<8x16xi32>
    %35 = arith.andi %32, %34 : vector<8x16xi1>
    %36 = vector.shape_cast %30 : vector<8x1xf32> to vector<8x1xf32>
    %37 = vector.broadcast %36 : vector<8x1xf32> to vector<8x16xf32>
    %38 = arith.select %35, %37, %27 : vector<8x16xi1>, vector<8x16xf32>
    %39 = arith.subf %14, %38 : vector<8x16xf32>
    %40 = math.exp %39 : vector<8x16xf32>
    %c0_17 = arith.constant 0 : index
    %c0_18 = arith.constant 0 : index
    %41 = vector.load %arg5[%c0_17, %c0_18] : memref<16x16xf32, #tpu.memory_space<vmem>>, vector<16x16xf32>
    %cst_19 = arith.constant dense<0.000000e+00> : vector<8x16xf32>
    %42 = tpu.matmul %40, %41, %cst_19 {dimension_numbers = #tpu.dot_dimension_numbers<[1], [0], [0], [1], [0, 0, 1, 1], [], []>} : vector<8x16xf32>, vector<16x16xf32>, vector<8x16xf32> -> vector<8x16xf32>
    %43 = tpu.reciprocal %42 : vector<8x16xf32> -> vector<8x16xf32>
    %44 = arith.mulf %40, %43 : vector<8x16xf32>
    %c0_20 = arith.constant 0 : index
    %c0_21 = arith.constant 0 : index
    %45 = vector.load %arg6[%c0_20, %c0_21] : memref<16x64xf32, #tpu.memory_space<vmem>>, vector<16x64xf32>
    %cst_22 = arith.constant dense<0.000000e+00> : vector<8x64xf32>
    %46 = tpu.matmul %44, %45, %cst_22 {dimension_numbers = #tpu.dot_dimension_numbers<[1], [0], [0], [1], [0, 0, 1, 1], [], []>} : vector<8x16xf32>, vector<16x64xf32>, vector<8x64xf32> -> vector<8x64xf32>
    %c0_23 = arith.constant 0 : index
    %c0_24 = arith.constant 0 : index
    %47 = vector.load %arg8[%c0_23, %c0_24] : memref<8x64xf32, #tpu.memory_space<vmem>>, vector<8x64xf32>
    tpu.vector_store %arg8[%c0_23, %c0_24], %46 {strides = array<i32>} : memref<8x64xf32, #tpu.memory_space<vmem>>, vector<8x64xf32>,
    %48 = arith.subf %46, %1 : vector<8x64xf32>
    %49 = arith.mulf %48, %48 : vector<8x64xf32>
    %50 = vector.shape_cast %49 : vector<8x64xf32> to vector<1x8x64xf32>
    %cst_25 = arith.constant dense<0.000000e+00> : vector<1xf32>
    %51 = vector.multi_reduction <add>, %50, %cst_25 [1, 2] : vector<1x8x64xf32> to vector<1xf32>
    %52 = vector.shape_cast %51 : vector<1xf32> to vector<1x1x1xf32>
    %53 = vector.extract %52[0, 0, 0] : f32 from vector<1x1x1xf32>
    %54 = vector.broadcast %53 : f32 to vector<8x128xf32>
    %c0_26 = arith.constant 0 : index
    %c0_27 = arith.constant 0 : index
    %55 = vector.load %arg10[%c0_26, %c0_27] : memref<8x128xf32, #tpu.memory_space<vmem>>, vector<8x128xf32>
    tpu.vector_store %arg10[%c0_26, %c0_27], %54 {strides = array<i32>} : memref<8x128xf32, #tpu.memory_space<vmem>>, vector<8x128xf32>,
    return
  }
  func.func @transform_0(%arg0: i32) -> (i32, i32) {
    %c0_i32 = arith.constant 0 : i32
    %c0_i32_0 = arith.constant 0 : i32
    %c0_i32_1 = arith.constant 0 : i32
    return %c0_i32, %c0_i32_0 : i32, i32
  }
  func.func @transform_1(%arg0: i32) -> (i32, i32) {
    %c0_i32 = arith.constant 0 : i32
    %c0_i32_0 = arith.constant 0 : i32
    return %arg0, %c0_i32 : i32, i32
  }
  func.func @transform_2(%arg0: i32) -> (i32, i32) {
    %c0_i32 = arith.constant 0 : i32
    %c0_i32_0 = arith.constant 0 : i32
    %c0_i32_1 = arith.constant 0 : i32
    return %c0_i32, %c0_i32_0 : i32, i32
  }
  func.func @transform_3(%arg0: i32) -> (i32, i32) {
    %c0_i32 = arith.constant 0 : i32
    %c0_i32_0 = arith.constant 0 : i32
    %c0_i32_1 = arith.constant 0 : i32
    return %c0_i32, %c0_i32_0 : i32, i32
  }
  func.func @transform_4(%arg0: i32) -> (i32, i32) {
    %c0_i32 = arith.constant 0 : i32
    %c0_i32_0 = arith.constant 0 : i32
    %c0_i32_1 = arith.constant 0 : i32
    return %c0_i32, %c0_i32_0 : i32, i32
  }
  func.func @transform_5(%arg0: i32) -> (i32, i32) {
    %c0_i32 = arith.constant 0 : i32
    %c0_i32_0 = arith.constant 0 : i32
    %c0_i32_1 = arith.constant 0 : i32
    return %c0_i32, %c0_i32_0 : i32, i32
  }
  func.func @transform_6(%arg0: i32) -> (i32, i32) {
    %c0_i32 = arith.constant 0 : i32
    %c0_i32_0 = arith.constant 0 : i32
    %c0_i32_1 = arith.constant 0 : i32
    return %c0_i32, %c0_i32_0 : i32, i32
  }
  func.func @transform_7(%arg0: i32) -> (i32, i32) {
    %c0_i32 = arith.constant 0 : i32
    %c0_i32_0 = arith.constant 0 : i32
    return %arg0, %c0_i32 : i32, i32
  }
  func.func @transform_8(%arg0: i32) -> (i32, i32) {
    %c0_i32 = arith.constant 0 : i32
    %c0_i32_0 = arith.constant 0 : i32
    return %arg0, %c0_i32 : i32, i32
  }
  func.func @transform_9(%arg0: i32) -> (i32, i32) {
    %c0_i32 = arith.constant 0 : i32
    %c0_i32_0 = arith.constant 0 : i32
    return %arg0, %c0_i32 : i32, i32
  }
}

</mosaic_0001>

<bundles_post_ra>
// kernel: tpu_custom_call.1
= control target key start
LH: loop header
LB: loop body
LE: loop exit
PB: predicated region body
PF: predicated region fallthrough
CT: control target
= control target key end

     0   :  { %s1512_s0 = inlined_call_operand.<no memory space> [shape: f32[1,1], index: 0, kind: input, shape index: {}]   ;;  %s1513_s1 = inlined_call_operand.vmem [shape: f32[16,64], index: 1, kind: input, shape index: {}]   ;;  %s1514_s2 = inlined_call_operand.vmem [shape: f32[64,16], index: 2, kind: input, shape index: {}]   ;;  %s1515_s3 = inlined_call_operand.vmem [shape: f32[64,16], index: 3, kind: input, shape index: {}]   ;;  %s1516_s4 = inlined_call_operand.vmem [shape: f32[16,16], index: 4, kind: input, shape index: {}]   ;;  %s1517_s5 = inlined_call_operand.vmem [shape: f32[16,64], index: 5, kind: input, shape index: {}]   ;;  %s1518_s6 = inlined_call_operand.vmem [shape: f32[1,16], index: 6, kind: input, shape index: {}]   ;;  %s1519_s7 = inlined_call_operand.hbm [shape: f32[16,64], index: 7, kind: output, shape index: {0}]   ;;  %s1520_s8 = inlined_call_operand.hbm [shape: f32[16,16], index: 8, kind: output, shape index: {1}]   ;;  %s1521_s9 = inlined_call_operand.hbm [shape: f32[16,128], index: 9, kind: output, shape index: {2}]  }
   0x1   :  { %15 = sst [smem:[#allocation2]] %s1512_s0 }
   0x2   :  { %16 = vsyncpa [#allocation4], 0 }
   0x3   :  { %18 = vsyncpa [#allocation4 + $0x1], 0 }
   0x4   :  { %19 = vsyncpa [#allocation6], 0 }
   0x5   :  { %21 = vsyncpa [#allocation6 + $0x1], 0  ;;  %s1251_s11 = smov 0   ;;  %s1253_s12 = smov 0  }
   0x6   :  { %s1255_s13 = smov 0   ;;  %s1257_s14 = smov 0  }
   0x7 LB: > { %s1272_s0 = sadd.s32 4294967295, %s1190_s14   ;;  %s1522_s15 = sadd.s32 4294967294, %s1190_s14   ;;  %s1190_s14 = sphi %s1257_s14, %s1533_s14   ;;  %s1186_s13 = sphi %s1255_s13, %s1532_s13   ;;  %s1182_s12 = sphi %s1253_s12, %s1531_s12   ;;  %s1178_s11 = sphi %s1251_s11, %s1530_s11  }
   0x8   : > { %s1276_s16 = sadd.s32 1, %s1190_s14   ;;  %s186_s17 = sadd.s32 1, %s1186_s13 }
   0x9   : > { %s183_s18 = ssub.s32 %s1190_s14, %s1276_s16  ;;  %p196_p0 = scmp.ne.s32.totalorder %s1186_s13, %s1182_s12 }
   0xa   : > { %p184_p1 = scmp.eq.s32.totalorder %s183_s18, 0  ;;  %p197_p2 = scmp.eq.s32.totalorder %s1272_s0, 1 }
   0xb   : > { %p202_p3 = scmp.ne.s32.totalorder %s1182_s12, %s1178_s11  ;;  %p203_p4 = scmp.eq.s32.totalorder %s1522_s15, 1 }
   0xc   : > { %s1289_s19 = scalar_select %p184_p1, %s1186_s13, %s186_s17  }
   0xd   : > { %p1291_p5 = por %p197_p2, %p196_p0  ;;  %p1295_p6 = por %p203_p4, %p202_p3 }
   0xe   : > { %p886_p7 = scmp.ge.s32.totalorder %s1190_s14, 1  ;;  %p298_p8 = scmp.lt.s32.totalorder %s1190_s14, 3 }
  0x10   : > { %p299_p9 = pnand %p886_p7, %p298_p8 }
  0x11   : > { %v349_v0 = vld [vmem:[%s1514_s2] sm:$0xff] (!%p299_p9)  ;;  %v350_v1 = vld [vmem:[%s1514_s2 + $0x8] sm:$0xff] (!%p299_p9)  ;;  %v1192_v3 = vmov (!%p299_p9), 0.0|0.0   ;;  %v351_v6 = vld [vmem:[%s1514_s2 + $0x10] sm:$0xff] (!%p299_p9)  ;;  %p343_p10 = scmp.lt.s32.totalorder (!%p299_p9), %s1272_s0, 1  ;;  %vm1193_vm0 = vmmov (!%p299_p9), 0   ;;  %v525_v42 = vlaneseq (!%p299_p9) }
  0x12   : > { %302 = sbr.rel (%p299_p9) target bundleno = 1075 (0x433), region = 48  ;;  %v358_v2 = vld [vmem:[%s1515_s3] sm:$0xff] (!%p299_p9)  ;;  %980 = vmatprep.subr.bf16.mxu0 (!%p299_p9), %v1192_v3  ;;  %v981_v4 = vpack.c.bf16 (!%p299_p9), %v350_v1, %v349_v0  ;;  %992 = vmatprep.subr.bf16.mxu1 (!%p299_p9), %v1192_v3  ;;  %v359_v5 = vld [vmem:[%s1515_s3 + $0x8] sm:$0xff] (!%p299_p9)  ;;  %v352_v7 = vld [vmem:[%s1514_s2 + $0x18] sm:$0xff] (!%p299_p9)  ;;  %v1194_v11 = vmov (!%p299_p9), 0.0   ;;  %vm373_vm1 = vcmask (!%p299_p9), 523264  }
  0x13   : > { %v993_v8 = vpack.c.bf16 (!%p299_p9), %v359_v5, %v358_v2  ;;  %v360_v9 = vld [vmem:[%s1515_s3 + $0x10] sm:$0xff] (!%p299_p9)  ;;  %v361_v10 = vld [vmem:[%s1515_s3 + $0x18] sm:$0xff] (!%p299_p9)  ;;  %944 = vmatprep.mubr.msk.f32.mxu0 (!%p299_p9), %vm1193_vm0, %v1194_v11  ;;  %963 = vmatprep.mubr.msk.f32.mxu1 (!%p299_p9), %vm1193_vm0, %v1194_v11  ;;  %v984_v12 = vpack.c.bf16 (!%p299_p9), %v352_v7, %v351_v6  ;;  %v353_v14 = vld [vmem:[%s1514_s2 + $0x20] sm:$0xff] (!%p299_p9)  ;;  %s1523_s25 = sand.u32 (!%p299_p9), 1, %s1182_s12   ;;  %vm527_vm2 = vcmask (!%p299_p9), 64512   ;;  %vm520_vm3 = vcmask (!%p299_p9), 130048  }
  0x14   : > { %982 = vmatpush3.bf16.msra.mxu0 (!%p299_p9), %v981_v4  ;;  %v996_v13 = vpack.c.bf16 (!%p299_p9), %v361_v10, %v360_v9  ;;  %v354_v15 = vld [vmem:[%s1514_s2 + $0x28] sm:$0xff] (!%p299_p9)  ;;  %v362_v16 = vld [vmem:[%s1515_s3 + $0x20] sm:$0xff] (!%p299_p9)  ;;  %v355_v20 = vld [vmem:[%s1514_s2 + $0x30] sm:$0xff] (!%p299_p9)  ;;  %s1371_s29 = sshll.u32 (!%p299_p9), %s1523_s25, 3  ;;  %vm535_vm4 = vcmask (!%p299_p9), 130112   ;;  %v526_v43 = vand.u32 (!%p299_p9), 127, %v525_v42 }
  0x15   : > { %994 = vmatpush3.bf16.msra.mxu1 (!%p299_p9), %v993_v8  ;;  %983 = vmatprep.subr.bf16.mxu0 (!%p299_p9), %v1192_v3  ;;  %v363_v17 = vld [vmem:[%s1515_s3 + $0x28] sm:$0xff] (!%p299_p9)  ;;  %v987_v18 = vpack.c.bf16 (!%p299_p9), %v354_v15, %v353_v14  ;;  %v356_v21 = vld [vmem:[%s1514_s2 + $0x38] sm:$0xff] (!%p299_p9)  ;;  %v364_v22 = vld [vmem:[%s1515_s3 + $0x30] sm:$0xff] (!%p299_p9)  ;;  %s335_s30 = scalar_lea.vmem (!%p299_p9), [#allocation5], %s1371_s29  ;;  %s1524_s28 = scalar_lea.vmem (!%p299_p9), [#allocation3], %s1371_s29 }
  0x16   : > { %995 = vmatprep.subr.bf16.mxu1 (!%p299_p9), %v1192_v3  ;;  %v999_v19 = vpack.c.bf16 (!%p299_p9), %v363_v17, %v362_v16  ;;  %v365_v23 = vld [vmem:[%s1515_s3 + $0x38] sm:$0xff] (!%p299_p9)  ;;  %v990_v24 = vpack.c.bf16 (!%p299_p9), %v356_v21, %v355_v20  ;;  %v891_v28 = vld [vmem:[%s1518_s6] ss:$0 sm:$0xff] (!%p299_p9)  ;;  %v547_v40 = vld [vmem:[%s1516_s4 + $0x8] sm:$0xff] (!%p299_p9)  ;;  %vm539_vm5 = vcmp.ge.s32.totalorder (!%p299_p9), %v526_v43, 8  ;;  %vm540_vm6 = vcmp.lt.s32.totalorder (!%p299_p9), %v526_v43, 16 }
  0x17   : > { %v1002_v25 = vpack.c.bf16 (!%p299_p9), %v365_v23, %v364_v22  ;;  %v546_v39 = vld [vmem:[%s1516_s4] sm:$0xff] (!%p299_p9)  ;;  %vm532_vm7 = vcmp.lt.s32.totalorder (!%p299_p9), %v526_v43, 8  ;;  %vm541_vm8 = vmand (!%p299_p9), %vm539_vm5, %vm540_vm6  ;;  %v624_v52 = vld [vmem:[%s1517_s5 + $0x8] sm:$0xff] (!%p299_p9)  ;;  %s718_s10 = sand.u32 (!%p299_p9), 1, %s1272_s0   ;;  %s1195_s17 = smov (!%p299_p9), [#allocation5]  }
  0x18   : > { %985 = vmatpush3.bf16.msra.mxu0 (!%p299_p9), %v984_v12  ;;  %v1005_v41 = vpack.c.bf16 (!%p299_p9), %v547_v40, %v546_v39  ;;  %v623_v51 = vld [vmem:[%s1517_s5] sm:$0xff] (!%p299_p9)  ;;  %s1072_s18 = sshll.u32 (!%p299_p9), %s1195_s17, 4  ;;  %s1073_s18 = int_to_ptr.vmem [resolvable:$false] %s1072_s18 }
  0x19   : > { %s344_s26 = scalar_select %p343_p10, %s1272_s0, 1  ;;  %997 = vmatpush3.bf16.msra.mxu1 %v996_v13  ;;  %986 = vmatprep.subr.bf16.mxu0 %v1192_v3  ;;  %v1008_v53 = vpack.c.bf16 %v624_v52, %v623_v51 }
  0x1a   : > { %998 = vmatprep.subr.bf16.mxu1 %v1192_v3 }
  0x1b   : > { %s890_s23 = sshll.u32 %s344_s26, 3  ;;  %s1399_s26 = sshll.u32 %s1272_s0, 7 }
  0x1c   : > { %s346_s22 = scalar_lea.vmem %s1513_s1, %s890_s23  ;;  %988 = vmatpush3.bf16.msra.mxu0 %v987_v18  ;;  %s347_s23 = sld [smem:[#allocation2]] }
  0x1d   : > { %1000 = vmatpush3.bf16.msra.mxu1 %v999_v19  ;;  %989 = vmatprep.subr.bf16.mxu0 %v1192_v3  ;;  %v1356_v26 = vld [vmem:[%s346_s22] sm:$0xff]  ;;  %s1405_s22 = scalar_lea.hbm %s1520_s8, %s1399_s26  ;;  %s1415_s15 = scalar_lea.hbm %s1519_s7, %s1399_s26 }
  0x1e   : > { %1001 = vmatprep.subr.bf16.mxu1 %v1192_v3  ;;  %v357_v27 = vmul.f32 %v1356_v26, %v1356_v26  ;;  %s1417_s0 = scalar_lea.sflag [#allocation6], %s718_s10 }
  0x20   : > { %991 = vmatpush3.bf16.msra.mxu0 %v990_v24 }
  0x21   : > { %1003 = vmatpush3.bf16.msra.mxu1 %v1002_v25  ;;  %1004 = vmatprep.subr.bf16.mxu0 %v1192_v3 }
  0x22   : > { %1007 = vmatprep.subr.bf16.mxu1 %v1192_v3  ;;  %s522_s24 = ssub.f32 0.0, %s347_s23  ;;  %s750_s23 = sshll.u32 %s335_s30, 4  ;;  %s1409_s23 = int_to_ptr.vmem [resolvable:$true] %s750_s23 }
  0x23   : > { %945 = vmatmul.mubr.msk.f32.vlgmr.msra.gmra.mrb[0].mxu0 %vm373_vm1, %v1356_v26  ;;  %s1068_s25 = scalar_lea.vmem %s1409_s23, 128  ;;  %p1075_p0 = scmp.lt.s32.totalorder %s1409_s23, %s1073_s18 }
  0x24   : > { %964 = vmatmul.mubr.msk.f32.vlgmr.msra.gmra.mrb[0].mxu1 %vm373_vm1, %v357_v27  ;;  %970 = vmatprep.mubr.msk.f32.mxu0 %vm1193_vm0, %v1194_v11  ;;  %v523_v30 = vstv %s522_s24  ;;  %p1069_p11 = scmp.ne.s32.totalorder %s1409_s23, %s1068_s25 }
  0x25   : > { %977 = vmatprep.mubr.msk.f32.mxu1 %vm1193_vm0, %v1194_v11  ;;  %1006 = vmatpush3.bf16.msra.mxu0 %v1005_v41 }
  0x26   : > { %1009 = vmatpush3.bf16.msra.mxu1 %v1008_v53  ;;  %p1070_p12 = pnand %p1069_p11, %p1291_p5 }
  0x28   : > { %p1071_p13 = pneg %p1070_p12 }
  0xf6   : > { %v443_v29 = vpop.f32.mrb[0].mxu0 }
  0xf7   : > { %v444_v31 = vadd.f32 %v891_v28, %v443_v29  ;;  %v946_v32 = vpop.f32.mrb[1].mxu0  ;;  %v516_v33 = vpop.f32.mrb[0].mxu1 }
  0xf8   : > { %v965_v34 = vpop.f32.mrb[1].mxu1 }
  0xf9   : > { %v524_v35 = vmul.f32 %v523_v30, %v444_v31  ;;  %v517_v36 = vadd.f32 %v516_v33, %v444_v31 }
  0xfb   : > { %v528_v37 = vsel %vm527_vm2, %v524_v35, -inf  ;;  %521 = vst.msk [vmem:[%s335_s30] sm:$0xff] %vm520_vm3, %v517_v36  ;;  %v536_v38 = vsel %vm535_vm4, %v524_v35, -inf  ;;  %s1074_s30 = scalar_lea.vmem %s1073_s18, 256 }
  0xfc   : > { %529 = vmax.xlane.f32.xlu0 %v528_v37  ;;  %p1076_p1 = scmp.lt.s32.totalorder %s1074_s30, %s1068_s25 }
  0xfe   : > { %p1077_p2 = por %p1076_p1, %p1075_p0 }
 0x100   : > { %537 = vmax.xlane.f32.xlu0 %v536_v38  ;;  %p1078_p3 = pnand %p1077_p2, %p1071_p13 }
 0x189   : > { %v530_v44 = vpop.xlane.xlu0 %529 }
 0x18a   : > { %v534_v45 = vsel %vm532_vm7, %v530_v44, 0.0 }
 0x18d   : > { %v538_v46 = vpop.xlane.xlu0 %537 }
 0x18e   : > { %v542_v47 = vsel %vm541_vm8, %v538_v46, %v534_v45 }
 0x18f   : > { %v543_v48 = vsub.f32 %v524_v35, %v542_v47 }
 0x191   : > { %v544_v49 = vmul.f32 1.442695, %v543_v48 }
 0x193   : > { %1064 = vpow2.f32 %v544_v49 }
 0x19d   : > { %v1065_v50 = vpop.eup %1064 }
 0x19e   : > { %971 = vmatmul.mubr.msk.f32.vlgmr.msra.gmra.mrb[2].mxu0 %vm520_vm3, %v1065_v50 }
 0x271   : > { %v617_v54 = vpop.f32.mrb[2].mxu0 }
 0x272   : > { %1066 = vrcp.f32 %v617_v54  ;;  %v972_v55 = vpop.f32.mrb[3].mxu0 }
 0x27c   : > { %v1067_v56 = vpop.eup %1066 }
 0x27d   : > { %v622_v57 = vmul.f32 %v1067_v56, %v1065_v50 }
 0x27f   : > { %978 = vmatmul.mubr.msk.f32.vlgmr.msra.gmra.mrb[2].mxu1 %vm520_vm3, %v622_v57 }
 0x352   : > { %v694_v58 = vpop.f32.mrb[2].mxu1 }
 0x353   : > { %698 = vst.msk [vmem:[%s1524_s28] sm:$0xff] %vm373_vm1, %v694_v58  ;;  %v699_v59 = vsub.f32 %v694_v58, %v1356_v26  ;;  %v979_v60 = vpop.f32.mrb[3].mxu1 }
 0x355   : > { %v700_v61 = vmul.f32 %v699_v59, %v699_v59 }
 0x357   : > { %v701_v62 = vsel %vm373_vm1, %v700_v61, 0.0 }
 0x358   : > { %702 = vadd.xlane.f32.xlu1 %v701_v62 }
 0x359   : > { %1081 = shalt.err (!%p1078_p3)
}
 0x35a   : > { %s1082_s10 = scalar_lea.hbm %s1405_s22, 128  ;;  %s1086_s17 = scalar_lea.hbm %s1520_s8, 256 }
 0x35b   : > { %p1083_p4 = scmp.ne.s32.totalorder %s1405_s22, %s1082_s10  ;;  %p1087_p9 = scmp.lt.u32.totalorder %s1405_s22, %s1520_s8 }
 0x35c   : > { %p1088_p10 = scmp.lt.u32.totalorder %s1086_s17, %s1082_s10  ;;  %p1090_p12 = scmp.lt.u32.totalorder %s1082_s10, %s1405_s22 }
 0x35d   : > { %p1084_p7 = pnand %p1083_p4, %p1291_p5 }
 0x35e   : > { %p1089_p11 = por %p1088_p10, %p1087_p9 }
 0x35f   : > { %p1085_p8 = pneg %p1084_p7 }
 0x360   : > { %p1091_p13 = por %p1090_p12, %p1089_p11 }
 0x362   : > { %p1092_p0 = pnand %p1091_p13, %p1085_p8 }
 0x364   : > { %1095 = shalt.err (!%p1092_p0)
}
 0x365   : > { %1013 = dma.vmem_to_hbm [thread:$0]  (%p1291_p5), %s1409_s23, 128, %s1405_s22, %s1417_s0  }
 0x366   : > { %s1527_s25 = scalar_lea.vmem [#allocation3], %s1371_s29  ;;  %s1528_s28 = sand.u32 1, %s1182_s12  }
 0x367   : > { %s737_s30 = sshll.u32 %s1527_s25, 4  ;;  %s714_s24 = scalar_lea.sflag [#allocation4], %s1528_s28  ;;  %s738_s30 = int_to_ptr.vmem [resolvable:$true] %s737_s30 }
 0x368   : > { %s1096_s27 = scalar_lea.vmem %s738_s30, 128  ;;  %s1196_s10 = smov [#allocation3]  }
 0x369   : > { %p1097_p1 = scmp.ne.s32.totalorder %s738_s30, %s1096_s27  ;;  %s1100_s17 = sshll.u32 %s1196_s10, 4  ;;  %s1101_s17 = int_to_ptr.vmem [resolvable:$false] %s1100_s17 }
 0x36a   : > { %s1102_s18 = scalar_lea.vmem %s1101_s17, 256  ;;  %p1103_p4 = scmp.lt.s32.totalorder %s738_s30, %s1101_s17 }
 0x36b   : > { %p1098_p2 = pnand %p1097_p1, %p1291_p5  ;;  %p1104_p7 = scmp.lt.s32.totalorder %s1102_s18, %s1096_s27 }
 0x36d   : > { %p1099_p3 = pneg %p1098_p2  ;;  %p1105_p8 = por %p1104_p7, %p1103_p4 }
 0x36f   : > { %p1106_p9 = pnand %p1105_p8, %p1099_p3 }
 0x371   : > { %1109 = shalt.err (!%p1106_p9)
}
 0x372   : > { %s1110_s22 = scalar_lea.hbm %s1415_s15, 128  ;;  %s1114_s28 = scalar_lea.hbm %s1519_s7, 256 }
 0x373   : > { %p1111_p10 = scmp.ne.s32.totalorder %s1415_s15, %s1110_s22  ;;  %p1115_p13 = scmp.lt.u32.totalorder %s1415_s15, %s1519_s7 }
 0x374   : > { %p1116_p0 = scmp.lt.u32.totalorder %s1114_s28, %s1110_s22  ;;  %p1118_p2 = scmp.lt.u32.totalorder %s1110_s22, %s1415_s15 }
 0x375   : > { %p1112_p11 = pnand %p1111_p10, %p1291_p5 }
 0x376   : > { %p1117_p1 = por %p1116_p0, %p1115_p13 }
 0x377   : > { %p1113_p12 = pneg %p1112_p11 }
 0x378   : > { %p1119_p3 = por %p1118_p2, %p1117_p1 }
 0x37a   : > { %p1120_p4 = pnand %p1119_p3, %p1113_p12 }
 0x37c   : > { %1123 = shalt.err (!%p1120_p4)
}
 0x37d   : > { %1012 = dma.vmem_to_hbm [thread:$0]  (%p1291_p5), %s738_s30, 128, %s1415_s15, %s714_s24  }
 0x37e   : > { %s342_s27 = scalar_lea.vmem [#allocation7], %s1371_s29  ;;  %s1469_s15 = scalar_lea.hbm %s1521_s9, %s1399_s26 }
 0x37f   : > { %s763_s18 = sshll.u32 %s342_s27, 4  ;;  %s1197_s29 = smov [#allocation7]   ;;  %s1463_s18 = int_to_ptr.vmem [resolvable:$true] %s763_s18 }
 0x380   : > { %s1124_s30 = scalar_lea.vmem %s1463_s18, 128  ;;  %s1128_s24 = sshll.u32 %s1197_s29, 4  ;;  %s1129_s24 = int_to_ptr.vmem [resolvable:$false] %s1128_s24 }
 0x381   : > { %p1125_p7 = scmp.ne.s32.totalorder %s1463_s18, %s1124_s30  ;;  %s1130_s28 = scalar_lea.vmem %s1129_s24, 256 }
 0x382   : > { %p1131_p10 = scmp.lt.s32.totalorder %s1463_s18, %s1129_s24  ;;  %p1132_p11 = scmp.lt.s32.totalorder %s1130_s28, %s1124_s30 }
 0x383   : > { %p1126_p8 = pnand %p1125_p7, %p1291_p5 }
 0x384   : > { %p1133_p12 = por %p1132_p11, %p1131_p10 }
 0x385   : > { %p1127_p9 = pneg %p1126_p8 }
 0x387   : > { %p1134_p13 = pnand %p1133_p12, %p1127_p9 }
 0x3e5   : > { %v703_v63 = vpop.xlane.xlu1 %702 }
 0x3e6   : > { %v704_v0 = vrot.slane %v703_v63, 4 }
 0x3e8   : > { %v705_v1 = vadd.f32 %v704_v0, %v703_v63 }
 0x3ea   : > { %v706_v2 = vrot.slane %v705_v1, 2 }
 0x3ec   : > { %v707_v3 = vadd.f32 %v706_v2, %v705_v1 }
 0x3ee   : > { %v708_v4 = vrot.slane %v707_v3, 1 }
 0x3f0   : > { %v709_v5 = vadd.f32 %v708_v4, %v707_v3 }
 0x3f2   : > { %1010 = vpush %v709_v5 }
 0x423   : > { %s1011_s22 = spop %1010 }
 0x424   : > { %v711_v6 = vstv %s1011_s22 }
 0x425   : > { %712 = vst [vmem:[%s342_s27] sm:$0xff] %v711_v6 }
 0x426   : > { %1137 = shalt.err (!%p1134_p13)
}
 0x427   : > { %s1138_s26 = scalar_lea.hbm %s1469_s15, 128  ;;  %s1142_s27 = scalar_lea.hbm %s1521_s9, 256 }
 0x428   : > { %p1139_p0 = scmp.ne.s32.totalorder %s1469_s15, %s1138_s26  ;;  %p1143_p3 = scmp.lt.u32.totalorder %s1469_s15, %s1521_s9 }
 0x429   : > { %p1144_p4 = scmp.lt.u32.totalorder %s1142_s27, %s1138_s26  ;;  %p1146_p8 = scmp.lt.u32.totalorder %s1138_s26, %s1469_s15 }
 0x42a   : > { %p1140_p1 = pnand %p1139_p0, %p1291_p5 }
 0x42b   : > { %p1145_p7 = por %p1144_p4, %p1143_p3 }
 0x42c   : > { %p1141_p2 = pneg %p1140_p1 }
 0x42d   : > { %p1147_p9 = por %p1146_p8, %p1145_p7 }
 0x42f   : > { %p1148_p10 = pnand %p1147_p9, %p1141_p2 }
 0x431   : > { %1151 = shalt.err (!%p1148_p10)
}
 0x432   : > { %1014 = dma.vmem_to_hbm [thread:$0]  (%p1291_p5), %s1463_s18, 128, %s1469_s15, %s1417_s0  }
 0x433 PF: > { %p1028_p11 = scmp.ge.s32.totalorder %s1190_s14, 2  ;;  %s775_s25 = sand.u32 1, %s1178_s11  }
 0x434   : > { %s776_s30 = scalar_lea.sflag [#allocation4], %s775_s25 }
 0x435   : > { %p1019_p12 = pnand %p1028_p11, %p1295_p6 }
 0x437   : > { %1169 = dma.done.wait (!%p1019_p12), %s776_s30, 128  }
 0x438   : > { %1171 = vsyncadd (!%p1019_p12), %s776_s30, 4294967168  ;;  %s1529_s29 = sadd.s32 4294967294, %s1190_s14  }
 0x439   : > { %s784_s24 = sand.u32 1, %s1529_s29  }
 0x43a   : > { %s785_s28 = scalar_lea.sflag [#allocation6], %s784_s24 }
 0x43b   : > { %1173 = dma.done.wait (!%p1019_p12), %s785_s28, 256  }
 0x43c   : > { %1175 = vsyncadd (!%p1019_p12), %s785_s28, 4294967040  ;;  %p24_p5 = scmp.ge.s32.totalorder %s1276_s16, 4   ;;  %s1530_s11 = smov %s1182_s12 }
 0x43d   : > { %s1531_s12 = smov %s1186_s13  ;;  %s1532_s13 = smov %s1289_s19 }
 0x43e   : > { %s1533_s14 = smov %s1276_s16  ;;  %26 = sbr.rel (!%p24_p5) target bundleno = 7 (0x7), region = 115 }
 0x445   :  { %799 = vsyncpa [#allocation4], 1 }
 0x446   :  { %801 = vsyncpa [#allocation4 + $0x1], 1 }
 0x447   :  { %802 = vsyncpa [#allocation6], 1 }
 0x448   :  { %804 = vsyncpa [#allocation6 + $0x1], 1 }

</bundles_post_ra>
